<compile_context>
chip_gen: v7x
topology: tpu7x:2x2x1
jax: 0.10.0
libtpu: 0.0.40
codegen_flags: <defaults>
</compile_context>

<pallas_src>
import math

import jax
import jax.numpy as jnp
from jax.experimental import pallas as pl
from jax.experimental.pallas import tpu as pltpu


def _scalar_mix_kernel(coef_ref, *refs):
    # coef_ref : SMEM (N,) f32, softmax(weights) already scaled by gamma
    # refs[:-1]: VMEM (tm, C) tiles, one per layer tensor
    # refs[-1] : VMEM (tm, C) output tile
    x_refs = refs[:-1]
    o_ref = refs[-1]
    acc = coef_ref[0] * x_refs[0][...].astype(jnp.float32)
    for k in range(1, len(x_refs)):        # static, unrolled over layers
        acc = acc + coef_ref[k] * x_refs[k][...].astype(jnp.float32)
    o_ref[...] = acc.astype(o_ref.dtype)


def scalar_mix(tensors, weights, gamma, *, lane=512, rows=1024):
    """tensors: list of N arrays, all the same shape. Returns an array of that shape."""
    n = len(tensors)
    shape = tensors[0].shape
    dtype = tensors[0].dtype
    total = math.prod(shape)
    itemsize = jnp.dtype(dtype).itemsize

    # ---- lane-dense (R, C) layout; avoid any padding copy when total % 128 == 0.
    if total % 128 == 0:
        C = 128
        for cand in (lane, 256, 128):
            if total % cand == 0:
                C = cand
                break
        padded_total = total
    else:
        # Rare fallback: pad the flattened view up to a multiple of 128
        # (costs one extra HBM round trip per input, but keeps stores full-width).
        C = 128
        padded_total = pl.cdiv(total, C) * C
    R = padded_total // C

    # ---- row tile: as large as fits a conservative double-buffered VMEM budget
    # (2 buffers for each of the N inputs plus the output).
    budget = 24 * 1024 * 1024
    tm = rows
    while tm > 8 and 2 * (n + 1) * tm * C * itemsize > budget:
        tm //= 2
    if tm > R:
        tm = R            # block dim == full array dim is always legal
    grid = pl.cdiv(R, tm)  # partial last block handled by Pallas (elementwise op)

    def as_slab(t):
        f = t.reshape(-1)
        if padded_total != total:
            f = jnp.pad(f, (0, padded_total - total))
        return f.reshape(R, C)

    xs = [as_slab(t) for t in tensors]

    # softmax of the N scalar weights (+ gamma fold) is O(N) scalar glue in the
    # wrapper; the hot N*M*H reduction runs inside the Pallas kernel.
    coef = (gamma.astype(jnp.float32).reshape(())
            * jax.nn.softmax(weights.astype(jnp.float32), axis=-1))   # (N,)

    tile_spec = pl.BlockSpec((tm, C), lambda i: (i, 0))

    vmem_need = 2 * (n + 1) * tm * C * itemsize + 4 * 1024 * 1024
    vmem_limit = min(64 * 1024 * 1024, max(32 * 1024 * 1024, vmem_need))

    out = pl.pallas_call(
        _scalar_mix_kernel,
        out_shape=jax.ShapeDtypeStruct((R, C), dtype),
        grid=(grid,),
        in_specs=[pl.BlockSpec(memory_space=pltpu.SMEM)] + [tile_spec] * n,
        out_specs=tile_spec,
        compiler_params=pltpu.CompilerParams(
            dimension_semantics=("parallel",),
            vmem_limit_bytes=vmem_limit,
        ),
    )(coef, *xs)

    if padded_total != total:
        return out.reshape(-1)[:total].reshape(shape)
    return out.reshape(shape)


if __name__ == "__main__":
    # Module parameters (deterministic, as in ScalarMix.__init__)
    n_layers = 4
    weights = jnp.zeros((n_layers,), dtype=jnp.float32)   # nn.Parameter(torch.zeros(n_layers))
    gamma = jnp.array([1.0], dtype=jnp.float32)           # nn.Parameter(torch.tensor([1.0]))

    # Example inputs: N layer tensors of shape (B, S, H)
    B, S, H = 2, 8, 32
    key = jax.random.PRNGKey(0)
    keys = jax.random.split(key, n_layers)
    tensors = [jax.random.normal(k, (B, S, H), dtype=jnp.float32) for k in keys]

    out = scalar_mix(tensors, weights, gamma)
    out = jax.block_until_ready(out)

    # Reference (plain JAX) check of the forward semantics.
    s = jax.nn.softmax(weights)
    ref = gamma[0] * sum(s[k] * tensors[k] for k in range(n_layers))
    assert out.shape == (B, S, H)
    assert jnp.allclose(out, ref, atol=1e-5, rtol=1e-5)

    print("KERNEL_OK")
</pallas_src>

<mosaic_0001>
module attributes {stable_mosaic.version = 11 : i64} {
  func.func @_scalar_mix_kernel(%arg0: i32, %arg1: memref<4xf32, #tpu.memory_space<smem>>, %arg2: memref<1x512xf32, #tpu.memory_space<vmem>>, %arg3: memref<1x512xf32, #tpu.memory_space<vmem>>, %arg4: memref<1x512xf32, #tpu.memory_space<vmem>>, %arg5: memref<1x512xf32, #tpu.memory_space<vmem>>, %arg6: memref<1x512xf32, #tpu.memory_space<vmem>>) attributes {dimension_semantics = [#tpu.dimension_semantics<parallel>], iteration_bounds = array<i64: 1>, scalar_prefetch = 0 : i64, scratch_operands = 0 : i64, tpu.core_type = #tpu.core_type<tc>, window_params = [{transform_indices = @transform_0, window_bounds = array<i64: 4>}, {transform_indices = @transform_1, window_bounds = array<i64: 1, 512>}, {transform_indices = @transform_2, window_bounds = array<i64: 1, 512>}, {transform_indices = @transform_3, window_bounds = array<i64: 1, 512>}, {transform_indices = @transform_4, window_bounds = array<i64: 1, 512>}, {transform_indices = @transform_5, window_bounds = array<i64: 1, 512>}]} {
    %c0 = arith.constant 0 : index
    %0 = memref.load %arg1[%c0] : memref<4xf32, #tpu.memory_space<smem>>
    %c0_0 = arith.constant 0 : index
    %c0_1 = arith.constant 0 : index
    %1 = vector.load %arg2[%c0_0, %c0_1] : memref<1x512xf32, #tpu.memory_space<vmem>>, vector<1x512xf32>
    %2 = vector.broadcast %0 : f32 to vector<1x512xf32>
    %3 = arith.mulf %2, %1 : vector<1x512xf32>
    %c1 = arith.constant 1 : index
    %4 = memref.load %arg1[%c1] : memref<4xf32, #tpu.memory_space<smem>>
    %c0_2 = arith.constant 0 : index
    %c0_3 = arith.constant 0 : index
    %5 = vector.load %arg3[%c0_2, %c0_3] : memref<1x512xf32, #tpu.memory_space<vmem>>, vector<1x512xf32>
    %6 = vector.broadcast %4 : f32 to vector<1x512xf32>
    %7 = arith.mulf %6, %5 : vector<1x512xf32>
    %8 = arith.addf %3, %7 : vector<1x512xf32>
    %c2 = arith.constant 2 : index
    %9 = memref.load %arg1[%c2] : memref<4xf32, #tpu.memory_space<smem>>
    %c0_4 = arith.constant 0 : index
    %c0_5 = arith.constant 0 : index
    %10 = vector.load %arg4[%c0_4, %c0_5] : memref<1x512xf32, #tpu.memory_space<vmem>>, vector<1x512xf32>
    %11 = vector.broadcast %9 : f32 to vector<1x512xf32>
    %12 = arith.mulf %11, %10 : vector<1x512xf32>
    %13 = arith.addf %8, %12 : vector<1x512xf32>
    %c3 = arith.constant 3 : index
    %14 = memref.load %arg1[%c3] : memref<4xf32, #tpu.memory_space<smem>>
    %c0_6 = arith.constant 0 : index
    %c0_7 = arith.constant 0 : index
    %15 = vector.load %arg5[%c0_6, %c0_7] : memref<1x512xf32, #tpu.memory_space<vmem>>, vector<1x512xf32>
    %16 = vector.broadcast %14 : f32 to vector<1x512xf32>
    %17 = arith.mulf %16, %15 : vector<1x512xf32>
    %18 = arith.addf %13, %17 : vector<1x512xf32>
    %c0_8 = arith.constant 0 : index
    %c0_9 = arith.constant 0 : index
    %19 = vector.load %arg6[%c0_8, %c0_9] : memref<1x512xf32, #tpu.memory_space<vmem>>, vector<1x512xf32>
    tpu.vector_store %arg6[%c0_8, %c0_9], %18 {strides = array<i32>} : memref<1x512xf32, #tpu.memory_space<vmem>>, vector<1x512xf32>,
    return
  }
  func.func @transform_0(%arg0: i32) -> i32 {
    %c0_i32 = arith.constant 0 : i32
    %c0_i32_0 = arith.constant 0 : i32
    return %c0_i32 : i32
  }
  func.func @transform_1(%arg0: i32) -> (i32, i32) {
    %c0_i32 = arith.constant 0 : i32
    %c0_i32_0 = arith.constant 0 : i32
    return %arg0, %c0_i32 : i32, i32
  }
  func.func @transform_2(%arg0: i32) -> (i32, i32) {
    %c0_i32 = arith.constant 0 : i32
    %c0_i32_0 = arith.constant 0 : i32
    return %arg0, %c0_i32 : i32, i32
  }
  func.func @transform_3(%arg0: i32) -> (i32, i32) {
    %c0_i32 = arith.constant 0 : i32
    %c0_i32_0 = arith.constant 0 : i32
    return %arg0, %c0_i32 : i32, i32
  }
  func.func @transform_4(%arg0: i32) -> (i32, i32) {
    %c0_i32 = arith.constant 0 : i32
    %c0_i32_0 = arith.constant 0 : i32
    return %arg0, %c0_i32 : i32, i32
  }
  func.func @transform_5(%arg0: i32) -> (i32, i32) {
    %c0_i32 = arith.constant 0 : i32
    %c0_i32_0 = arith.constant 0 : i32
    return %arg0, %c0_i32 : i32, i32
  }
}

</mosaic_0001>

<bundles_post_ra>
// kernel: tpu_custom_call.1
= control target key start
LH: loop header
LB: loop body
LE: loop exit
PB: predicated region body
PF: predicated region fallthrough
CT: control target
= control target key end

     0   :  { %10 = vsyncpa [#allocation5], 0  ;;  %s228_s0 = inlined_call_operand.hbm [shape: f32[4], index: 0, kind: input, shape index: {}]   ;;  %s229_s1 = inlined_call_operand.hbm [shape: f32[1,512], index: 1, kind: input, shape index: {}]   ;;  %s230_s2 = inlined_call_operand.vmem [shape: f32[1,512], index: 2, kind: input, shape index: {}]   ;;  %s231_s3 = inlined_call_operand.vmem [shape: f32[1,512], index: 3, kind: input, shape index: {}]   ;;  %s232_s4 = inlined_call_operand.vmem [shape: f32[1,512], index: 4, kind: input, shape index: {}]   ;;  %s233_s5 = inlined_call_operand.hbm [shape: f32[1,512], index: 5, kind: output, shape index: {}]  }
   0x1   :  { %11 = vsyncpa [#allocation3], 0 }
   0x2   :  { %12 = vsyncpa [#allocation4], 0  ;;  %s90_s20 = scalar_lea.hbm %s228_s0, 16 }
   0x3   :  { %p91_p0 = scmp.ne.s32.totalorder %s228_s0, %s90_s20  ;;  %p94_p1 = scmp.lt.u32.totalorder %s90_s20, %s228_s0 }
   0x5   :  { %p96_p2 = pnand %p94_p1, %p91_p0 }
   0x7   :  { %99 = shalt.err (!%p96_p2)
}
   0x8   :  { %s150_s25 = smov [#allocation2]   ;;  %s151_s28 = smov [#allocation6]  }
   0x9   :  { %20 = dma.hbm_to_smem %s228_s0, 16, %s150_s25, [#allocation5]  }
   0xa   :  { %s27_s29 = sshll.u32 %s151_s28, 4  ;;  %s100_s7 = scalar_lea.hbm %s229_s1, 64  ;;  %s28_s29 = int_to_ptr.vmem [resolvable:$true] %s27_s29 }
   0xb   :  { %p101_p3 = scmp.ne.s32.totalorder %s229_s1, %s100_s7  ;;  %p104_p4 = scmp.lt.u32.totalorder %s100_s7, %s229_s1 }
   0xd   :  { %p106_p5 = pnand %p104_p4, %p101_p3 }
   0xf   :  { %109 = shalt.err (!%p106_p5)
}
  0x10   :  { %s110_s12 = scalar_lea.vmem %s28_s29, 64  ;;  %p115_p7 = scmp.lt.s32.totalorder %s28_s29, %s28_s29 }
  0x11   :  { %p111_p6 = scmp.ne.s32.totalorder %s28_s29, %s110_s12  ;;  %p116_p8 = scmp.lt.s32.totalorder %s110_s12, %s110_s12 }
  0x13   :  { %p117_p9 = por %p116_p8, %p115_p7 }
  0x15   :  { %p118_p10 = pnand %p117_p9, %p111_p6 }
  0x17   :  { %121 = shalt.err (!%p118_p10)
}
  0x18   :  { %30 = dma.hbm_to_vmem [thread:$0]  %s229_s1, 64, %s28_s29, [#allocation3]  }
  0x19   :  { %144 = dma.done.wait [#allocation5], 16  }
  0x1a   :  { %145 = vsyncadd [#allocation5], 4294967280 }
  0x1b   :  { %146 = dma.done.wait [#allocation3], 64  }
  0x1c   :  { %147 = vsyncadd [#allocation3], 4294967232 }
  0x1d   :  { %43 = sfence }
  0x1e   :  { %s44_s14 = sld [smem:[#allocation2]]  ;;  %s84_s15 = sld [smem:[#allocation2 + $0x1]]  ;;  %v45_v0 = vld [vmem:[#allocation6] sm:$0xf]  ;;  %v49_v1 = vld [vmem:[%s230_s2] sm:$0xf]  ;;  %v63_v11 = vlaneseq }
  0x1f   :  { %s85_s16 = sld [smem:[#allocation2 + $0x2]]  ;;  %s86_s17 = sld [smem:[#allocation2 + $0x3]]  ;;  %v54_v2 = vld [vmem:[%s231_s3] sm:$0xf] }
  0x20   :  { %v59_v5 = vld [vmem:[%s232_s4] sm:$0xf]  ;;  %s152_s23 = smov [#allocation7]   ;;  %vm65_vm0 = vcmp.lt.s32.totalorder %v63_v11, 512 }
  0x21   :  { %s74_s2 = sshll.u32 %s152_s23, 4  ;;  %s75_s2 = int_to_ptr.vmem [resolvable:$true] %s74_s2 }
  0x22   :  { %s122_s3 = scalar_lea.vmem %s75_s2, 64  ;;  %p127_p12 = scmp.lt.s32.totalorder %s75_s2, %s75_s2 }
  0x23   :  { %p123_p11 = scmp.ne.s32.totalorder %s75_s2, %s122_s3  ;;  %p128_p13 = scmp.lt.s32.totalorder %s122_s3, %s122_s3 }
  0x24   :  { %v46_v3 = vstv %s44_s14  ;;  %v50_v4 = vstv %s84_s15 }
  0x25   :  { %v47_v6 = vmul.f32 %v46_v3, %v45_v0  ;;  %v51_v7 = vmul.f32 %v50_v4, %v49_v1  ;;  %v55_v8 = vstv %s85_s16  ;;  %v60_v10 = vstv %s86_s17  ;;  %p129_p0 = por %p128_p13, %p127_p12 }
  0x26   :  { %v56_v9 = vmul.f32 %v55_v8, %v54_v2  ;;  %v61_v13 = vmul.f32 %v60_v10, %v59_v5 }
  0x27   :  { %v52_v12 = vadd.f32 %v51_v7, %v47_v6  ;;  %p130_p1 = pnand %p129_p0, %p123_p11 }
  0x29   :  { %v57_v14 = vadd.f32 %v56_v9, %v52_v12 }
  0x2b   :  { %v62_v15 = vadd.f32 %v61_v13, %v57_v14 }
  0x2d   :  { %67 = vst.msk [vmem:[#allocation7] sm:$0xf] %vm65_vm0, %v62_v15 }
  0x2e   :  { %133 = shalt.err (!%p130_p1)
}
  0x2f   :  { %s134_s25 = scalar_lea.hbm %s233_s5, 64 }
  0x30   :  { %p135_p2 = scmp.ne.s32.totalorder %s233_s5, %s134_s25  ;;  %p138_p3 = scmp.lt.u32.totalorder %s134_s25, %s233_s5 }
  0x32   :  { %p140_p4 = pnand %p138_p3, %p135_p2 }
  0x34   :  { %143 = shalt.err (!%p140_p4)
}
  0x35   :  { %77 = dma.vmem_to_hbm [thread:$0]  %s75_s2, 64, %s233_s5, [#allocation4]  }
  0x36   :  { %148 = dma.done.wait [#allocation4], 64  }
  0x37   :  { %149 = vsyncadd [#allocation4], 4294967232 }
  0x38   :  { %81 = vsyncpa [#allocation3], 1 }
  0x39   :  { %82 = vsyncpa [#allocation4], 1 }
  0x3a   :  { %83 = vsyncpa [#allocation5], 1 }

</bundles_post_ra>
